<compile_context>
chip_gen: v5e
topology: v5e:2x2
jax: 0.10.0
libtpu: 0.0.40
codegen_flags: <defaults>
</compile_context>

<pallas_src>
import functools

import jax
import jax.numpy as jnp
from jax import lax
from jax.experimental import pallas as pl
from jax.experimental.pallas import tpu as pltpu


_LANE = 128
_TK_CAP = 8192          # hard cap on K-tile width (keeps per-step DMA sane)
_ROW_TILE_MIN_M = 256   # switch to the row-tiled (megacore) kernels at this M
_ROW_TILE_MAX = 512     # cap on the row-tile height
_VMEM_MARGIN = 4 * 1024 * 1024


def _round_up(x, m):
    return ((x + m - 1) // m) * m


def _cdiv(a, b):
    return -(-a // b)


def _vmem_limit_bytes():
    """Generation-aware VMEM limit: ~75% of physical capacity.

    96 MiB on v5e/v6e (128 MiB parts), 48 MiB on v7x (64 MiB)."""
    try:
        cap = pltpu.get_tpu_info().vmem_capacity_bytes
    except Exception:
        cap = 64 * 1024 * 1024  # conservative fallback: assume v7x-sized VMEM
    return (3 * cap) // 4


def _choose_tk(stream_rows, K, itemsize, feature_budget):
    """K-tile width and step count.

    tk is a multiple of 128 (or exactly K). The double-buffered feature
    stream of `stream_rows` rows per grid step fits `feature_budget` bytes.
    Tiles are balanced so masked waste in the last tile is < 128 columns —
    no HBM-side padding ever happens."""
    tk_cap = feature_budget // max(1, 2 * stream_rows * itemsize)
    tk_cap = max(_LANE, (tk_cap // _LANE) * _LANE)
    tk_cap = min(tk_cap, _TK_CAP)
    if K <= tk_cap:
        return K, 1                          # one step; full-K block is legal
    n = _cdiv(K, tk_cap)
    tk = _round_up(_cdiv(K, n), _LANE)       # balanced tiles, minimal waste
    return tk, _cdiv(K, tk)


def _row_tile(M):
    """Row-tile height for the M-split kernels (None => untiled path)."""
    if M < _ROW_TILE_MIN_M:
        return None
    best = None
    for tm in range(8, min(_ROW_TILE_MAX, M // 2) + 1, 8):
        if M % tm == 0:                      # exact tiling (no partial rows)
            best = tm
    return best


def _prep(x, compute_dtype):
    a, b, c, d = x.shape
    M, K = a * b, c * d
    f = x.reshape(M, K)                      # bit-compatible reshape (fused under jit)
    if compute_dtype is not None:
        f = f.astype(compute_dtype)          # e.g. bf16: halves HBM traffic
    return f, M, K, 1.0 / float(a * b * c * d)


def _mask_cols(f, k, tk, K):
    """Zero columns whose global index >= K (partial last K tile)."""
    col = k * tk + lax.broadcasted_iota(jnp.int32, f.shape, 1)
    return jnp.where(col < K, f, jnp.zeros_like(f))


# ---------------------------------------------------------------------------
# Standalone gram-matrix kernels (used once, for the detached target).
# ---------------------------------------------------------------------------
def _gram_kernel(f_ref, g_ref, *, scale, tk, K, mask_last):
    k = pl.program_id(0)

    @pl.when(k == 0)
    def _():
        g_ref[...] = jnp.zeros_like(g_ref)

    f = f_ref[...]
    if mask_last:
        f = _mask_cols(f, k, tk, K)
    # F @ F^T: contract dim 1 of both operands (no explicit transpose).
    g_ref[...] += lax.dot_general(f, f, (((1,), (1,)), ((), ())),
                                  preferred_element_type=jnp.float32)

    @pl.when(k == pl.num_programs(0) - 1)
    def _():
        g_ref[...] = g_ref[...] * scale


def _gram_kernel_tiled(fr_ref, fa_ref, g_ref, *, scale, tk, K, mask_last):
    k = pl.program_id(1)

    @pl.when(k == 0)
    def _():
        g_ref[...] = jnp.zeros_like(g_ref)

    fr = fr_ref[...]
    if mask_last:
        fr = _mask_cols(fr, k, tk, K)        # masking one operand suffices
    g_ref[...] += lax.dot_general(fr, fa_ref[...], (((1,), (1,)), ((), ())),
                                  preferred_element_type=jnp.float32)

    @pl.when(k == pl.num_programs(1) - 1)
    def _():
        g_ref[...] = g_ref[...] * scale


@functools.partial(jax.jit, static_argnames=("compute_dtype",))
def gram_matrix(x, *, compute_dtype=None):
    """x: [a, b, c, d] (NCHW). Returns G: [a*b, a*b] float32."""
    f, M, K, scale = _prep(x, compute_dtype)
    vmem_limit = _vmem_limit_bytes()
    tm = _row_tile(M)

    if tm is None:
        # Untiled: (M, M) f32 output resident (double-buffered by pipeline).
        resident = 2 * M * M * 4
        budget = max(0, vmem_limit - resident - _VMEM_MARGIN)
        tk, nk = _choose_tk(M, K, f.dtype.itemsize, budget)
        kernel = functools.partial(_gram_kernel, scale=scale, tk=tk, K=K,
                                   mask_last=(K % tk != 0))
        return pl.pallas_call(
            kernel,
            out_shape=jax.ShapeDtypeStruct((M, M), jnp.float32),
            grid_spec=pltpu.PrefetchScalarGridSpec(
                num_scalar_prefetch=0,
                grid=(nk,),
                in_specs=[pl.BlockSpec((M, tk), lambda k: (0, k))],
                out_specs=pl.BlockSpec((M, M), lambda k: (0, 0)),
            ),
            compiler_params=pltpu.CompilerParams(
                dimension_semantics=("arbitrary",),
                vmem_limit_bytes=vmem_limit),
        )(f)

    # Row-tiled: shards row blocks across TensorCores (v7x megacore) and
    # bounds the resident accumulator to (tm, M).
    resident = 2 * tm * M * 4
    budget = max(0, vmem_limit - resident - _VMEM_MARGIN)
    tk, nk = _choose_tk(tm + M, K, f.dtype.itemsize, budget)
    kernel = functools.partial(_gram_kernel_tiled, scale=scale, tk=tk, K=K,
                               mask_last=(K % tk != 0))
    return pl.pallas_call(
        kernel,
        out_shape=jax.ShapeDtypeStruct((M, M), jnp.float32),
        grid_spec=pltpu.PrefetchScalarGridSpec(
            num_scalar_prefetch=0,
            grid=(M // tm, nk),
            in_specs=[pl.BlockSpec((tm, tk), lambda i, k: (i, k)),
                      pl.BlockSpec((M, tk), lambda i, k: (0, k))],
            out_specs=pl.BlockSpec((tm, M), lambda i, k: (i, 0)),
        ),
        compiler_params=pltpu.CompilerParams(
            dimension_semantics=("parallel", "arbitrary"),
            vmem_limit_bytes=vmem_limit),
    )(f, f)


# ---------------------------------------------------------------------------
# Fused gram + MSE kernels: accumulate F @ F.T over K tiles, then in the
# final grid step compare against the resident target gram and emit the
# (partial) sum of squared differences.  One pallas_call, no HBM round-trip
# of G.
# ---------------------------------------------------------------------------
def _style_kernel(f_ref, t_ref, loss_ref, acc_ref, *, scale, tk, K, mask_last):
    k = pl.program_id(0)

    @pl.when(k == 0)
    def _():
        acc_ref[...] = jnp.zeros_like(acc_ref)

    f = f_ref[...]
    if mask_last:
        f = _mask_cols(f, k, tk, K)
    acc_ref[...] += lax.dot_general(f, f, (((1,), (1,)), ((), ())),
                                    preferred_element_type=jnp.float32)

    @pl.when(k == pl.num_programs(0) - 1)
    def _():
        diff = acc_ref[...] * scale - t_ref[...]
        loss_ref[0, 0] = jnp.sum(diff * diff)


def _style_kernel_tiled(fr_ref, fa_ref, t_ref, loss_ref, acc_ref, *,
                        scale, tk, K, mask_last):
    k = pl.program_id(1)

    @pl.when(k == 0)
    def _():
        acc_ref[...] = jnp.zeros_like(acc_ref)

    fr = fr_ref[...]
    if mask_last:
        fr = _mask_cols(fr, k, tk, K)
    acc_ref[...] += lax.dot_general(fr, fa_ref[...], (((1,), (1,)), ((), ())),
                                    preferred_element_type=jnp.float32)

    @pl.when(k == pl.num_programs(1) - 1)
    def _():
        diff = acc_ref[...] * scale - t_ref[...]
        p = jnp.sum(diff * diff)
        # Lane-dense (1, 128) output block per row tile; wrapper reads lane 0.
        loss_ref[...] = jnp.full((1, _LANE), p, dtype=jnp.float32)


@functools.partial(jax.jit, static_argnames=("compute_dtype",))
def style_loss(x, target_gram, *, compute_dtype=None):
    """mean((gram_matrix(x) - target_gram)^2), fused into one pallas_call."""
    f, M, K, scale = _prep(x, compute_dtype)
    t = target_gram.astype(jnp.float32)
    vmem_limit = _vmem_limit_bytes()
    tm = _row_tile(M)
    mm = float(M * M)

    if tm is None:
        # Resident VMEM: (M,M) f32 accumulator + single-buffered (M,M) target.
        resident = M * M * 4 + M * M * 4
        budget = max(0, vmem_limit - resident - _VMEM_MARGIN)
        tk, nk = _choose_tk(M, K, f.dtype.itemsize, budget)
        kernel = functools.partial(_style_kernel, scale=scale, tk=tk, K=K,
                                   mask_last=(K % tk != 0))
        out = pl.pallas_call(
            kernel,
            out_shape=jax.ShapeDtypeStruct((1, 1), jnp.float32),
            grid_spec=pltpu.PrefetchScalarGridSpec(
                num_scalar_prefetch=0,
                grid=(nk,),
                in_specs=[
                    pl.BlockSpec((M, tk), lambda k: (0, k)),
                    # Target never changes across K steps: whole-array VMEM
                    # operand => single copy, no double-buffering.
                    pl.BlockSpec(memory_space=pltpu.MemorySpace.VMEM),
                ],
                out_specs=pl.BlockSpec((1, 1), lambda k: (0, 0)),
                scratch_shapes=[pltpu.VMEM((M, M), jnp.float32)],
            ),
            compiler_params=pltpu.CompilerParams(
                dimension_semantics=("arbitrary",),
                vmem_limit_bytes=vmem_limit),
        )(f, t)
        return out[0, 0] / mm

    # Row-tiled fused path (M >= 256): partial per-row-tile losses, summed in
    # the wrapper; row blocks shard across TensorCores.
    ni = M // tm
    resident = tm * M * 4 + 2 * tm * M * 4   # acc + double-buffered target blk
    budget = max(0, vmem_limit - resident - _VMEM_MARGIN)
    tk, nk = _choose_tk(tm + M, K, f.dtype.itemsize, budget)
    kernel = functools.partial(_style_kernel_tiled, scale=scale, tk=tk, K=K,
                               mask_last=(K % tk != 0))
    partial = pl.pallas_call(
        kernel,
        out_shape=jax.ShapeDtypeStruct((1, ni * _LANE), jnp.float32),
        grid_spec=pltpu.PrefetchScalarGridSpec(
            num_scalar_prefetch=0,
            grid=(ni, nk),
            in_specs=[
                pl.BlockSpec((tm, tk), lambda i, k: (i, k)),
                pl.BlockSpec((M, tk), lambda i, k: (0, k)),
                pl.BlockSpec((tm, M), lambda i, k: (i, 0)),
            ],
            out_specs=pl.BlockSpec((1, _LANE), lambda i, k: (0, i)),
            scratch_shapes=[pltpu.VMEM((tm, M), jnp.float32)],
        ),
        compiler_params=pltpu.CompilerParams(
            dimension_semantics=("parallel", "arbitrary"),
            vmem_limit_bytes=vmem_limit),
    )(f, f, t)
    return jnp.sum(partial[0, ::_LANE]) / mm


# ---------------------------------------------------------------------------
# StyleLoss module equivalent.
# ---------------------------------------------------------------------------
class StyleLoss:
    """Forward returns its input; stores mse(gram(x), gram(target)) in .loss.

    `compute_dtype=jnp.bfloat16` is an optional perf knob (halves HBM traffic,
    native MXU dtype); the default None keeps the input dtype so f32 inputs
    match the PyTorch f32 semantics. Target and input grams always use the
    same compute_dtype so there is no mixed-precision bias between them.
    """

    def __init__(self, target_feature, *, compute_dtype=None):
        self.compute_dtype = compute_dtype
        # target gram matrix ("detached" — just a constant array here)
        self.target = gram_matrix(target_feature, compute_dtype=compute_dtype)
        self.loss = None

    def __call__(self, x):
        self.loss = style_loss(x, self.target, compute_dtype=self.compute_dtype)
        return x  # forward returns its input unchanged


if __name__ == "__main__":
    key = jax.random.PRNGKey(0)
    k1, k2, k3, k4 = jax.random.split(key, 4)

    def gram_ref(t):
        a, b, c, d = t.shape
        ff = t.reshape(a * b, c * d)
        return (ff @ ff.T) / (a * b * c * d)

    # --- small shape (untiled path): batch=2, channels=4, spatial=16x16 ---
    target_feature = jax.random.normal(k1, (2, 4, 16, 16), dtype=jnp.float32)
    x = jax.random.normal(k2, (2, 4, 16, 16), dtype=jnp.float32)

    style = StyleLoss(target_feature)
    out = style(x)
    out = jax.block_until_ready(out)
    loss = jax.block_until_ready(style.loss)

    t_ref = gram_ref(target_feature)
    loss_ref = jnp.mean((gram_ref(x) - t_ref) ** 2)
    assert out.shape == x.shape
    assert jnp.allclose(out, x)
    assert jnp.allclose(style.target, t_ref, rtol=1e-5, atol=1e-6)
    assert jnp.allclose(loss, loss_ref, rtol=1e-5, atol=1e-6), (loss, loss_ref)

    # --- M = 256 exercises the row-tiled (megacore) path ---
    tf2 = jax.random.normal(k3, (1, 256, 16, 16), dtype=jnp.float32)
    x2 = jax.random.normal(k4, (1, 256, 16, 16), dtype=jnp.float32)
    style2 = StyleLoss(tf2)
    _ = style2(x2)
    loss2 = jax.block_until_ready(style2.loss)

    t2_ref = gram_ref(tf2)
    loss2_ref = jnp.mean((gram_ref(x2) - t2_ref) ** 2)
    assert jnp.allclose(style2.target, t2_ref, rtol=1e-4, atol=1e-6)
    assert jnp.allclose(loss2, loss2_ref, rtol=1e-3, atol=1e-9), (loss2, loss2_ref)

    print("KERNEL_OK")
</pallas_src>

<mosaic_0001>
module attributes {stable_mosaic.version = 11 : i64} {
  func.func @_gram_kernel(%arg0: i32, %arg1: memref<8x256xf32, #tpu.memory_space<vmem>>, %arg2: memref<8x8xf32, #tpu.memory_space<vmem>>) attributes {dimension_semantics = [#tpu.dimension_semantics<arbitrary>], iteration_bounds = array<i64: 1>, scalar_prefetch = 0 : i64, scratch_operands = 0 : i64, tpu.core_type = #tpu.core_type<tc>, window_params = [{transform_indices = @transform_0, window_bounds = array<i64: 8, 256>}, {pipeline_mode = #tpu.pipeline_mode<synchronous>, transform_indices = @transform_1, window_bounds = array<i64: 8, 8>}]} {
    %c0_i32 = arith.constant 0 : i32
    %0 = arith.cmpi eq, %arg0, %c0_i32 : i32
    %1 = arith.extui %0 : i1 to i32
    %c0_i32_0 = arith.constant 0 : i32
    %2 = arith.cmpi ne, %1, %c0_i32_0 : i32
    scf.if %2 {
      %cst_8 = arith.constant 0.000000e+00 : f32
      %11 = vector.broadcast %cst_8 : f32 to vector<8x8xf32>
      %c0_9 = arith.constant 0 : index
      %c0_10 = arith.constant 0 : index
      %12 = vector.load %arg2[%c0_9, %c0_10] : memref<8x8xf32, #tpu.memory_space<vmem>>, vector<8x8xf32>
      tpu.vector_store %arg2[%c0_9, %c0_10], %11 {strides = array<i32>} : memref<8x8xf32, #tpu.memory_space<vmem>>, vector<8x8xf32>,
    } else {
    }
    %c0 = arith.constant 0 : index
    %c0_1 = arith.constant 0 : index
    %3 = vector.load %arg1[%c0, %c0_1] : memref<8x256xf32, #tpu.memory_space<vmem>>, vector<8x256xf32>
    %c0_2 = arith.constant 0 : index
    %c0_3 = arith.constant 0 : index
    %4 = vector.load %arg2[%c0_2, %c0_3] : memref<8x8xf32, #tpu.memory_space<vmem>>, vector<8x8xf32>
    %cst = arith.constant dense<0.000000e+00> : vector<8x8xf32>
    %5 = tpu.matmul %3, %3, %cst {dimension_numbers = #tpu.dot_dimension_numbers<[1], [1], [0], [0], [0, 0, 1, 0], [], []>} : vector<8x256xf32>, vector<8x256xf32>, vector<8x8xf32> -> vector<8x8xf32>
    %6 = arith.addf %4, %5 : vector<8x8xf32>
    %c0_4 = arith.constant 0 : index
    %c0_5 = arith.constant 0 : index
    %7 = vector.load %arg2[%c0_4, %c0_5] : memref<8x8xf32, #tpu.memory_space<vmem>>, vector<8x8xf32>
    tpu.vector_store %arg2[%c0_4, %c0_5], %6 {strides = array<i32>} : memref<8x8xf32, #tpu.memory_space<vmem>>, vector<8x8xf32>,
    %c0_i32_6 = arith.constant 0 : i32
    %8 = arith.cmpi eq, %arg0, %c0_i32_6 : i32
    %9 = arith.extui %8 : i1 to i32
    %c0_i32_7 = arith.constant 0 : i32
    %10 = arith.cmpi ne, %9, %c0_i32_7 : i32
    scf.if %10 {
      %c0_8 = arith.constant 0 : index
      %c0_9 = arith.constant 0 : index
      %11 = vector.load %arg2[%c0_8, %c0_9] : memref<8x8xf32, #tpu.memory_space<vmem>>, vector<8x8xf32>
      %cst_10 = arith.constant 4.8828125E-4 : f32
      %12 = vector.broadcast %cst_10 : f32 to vector<8x8xf32>
      %13 = arith.mulf %11, %12 : vector<8x8xf32>
      %c0_11 = arith.constant 0 : index
      %c0_12 = arith.constant 0 : index
      %14 = vector.load %arg2[%c0_11, %c0_12] : memref<8x8xf32, #tpu.memory_space<vmem>>, vector<8x8xf32>
      tpu.vector_store %arg2[%c0_11, %c0_12], %13 {strides = array<i32>} : memref<8x8xf32, #tpu.memory_space<vmem>>, vector<8x8xf32>,
    } else {
    }
    return
  }
  func.func @transform_0(%arg0: i32) -> (i32, i32) {
    %c0_i32 = arith.constant 0 : i32
    %c0_i32_0 = arith.constant 0 : i32
    return %c0_i32, %arg0 : i32, i32
  }
  func.func @transform_1(%arg0: i32) -> (i32, i32) {
    %c0_i32 = arith.constant 0 : i32
    %c0_i32_0 = arith.constant 0 : i32
    %c0_i32_1 = arith.constant 0 : i32
    return %c0_i32, %c0_i32_0 : i32, i32
  }
}

</mosaic_0001>

<bundles_post_ra>
// kernel: gram_matrix.1
= control target key start
LH: loop header
LB: loop body
LE: loop exit
PB: predicated region body
PF: predicated region fallthrough
CT: control target
= control target key end

     0   :  { %s135_s0 = inlined_call_operand.vmem [shape: f32[8,256], index: 0, kind: input, shape index: {}]   ;;  %s136_s1 = inlined_call_operand.hbm [shape: f32[8,8], index: 1, kind: output, shape index: {}]  }
   0x1   :  { %v15_v0 = vld [vmem:[%s135_s0] sm:$0xff]  ;;  %v16_v1 = vld [vmem:[%s135_s0 + $0x8] sm:$0xff] }
   0x2   :  { %6 = vsyncpa [#allocation3], 0  ;;  %33 = vmatpush.xpose.msra.mxu0 %v15_v0  ;;  %53 = vmatpush.xpose.msra.mxu1 %v16_v1  ;;  %vm13_vm0 = vcmask 64512   ;;  %v111_v2 = vmov 0.0   ;;  %s112_s10 = smov [#allocation2]   ;;  %s74_s13 = sshll.u32 %s136_s1, 4  ;;  %s75_s13 = int_to_ptr.hbm [resolvable:$true] %s74_s13 }
   0x3   :  { %14 = vst.msk [vmem:[#allocation2] sm:$0xff] %vm13_vm0, %v111_v2  ;;  %s72_s11 = sshll.u32 %s112_s10, 4  ;;  %s73_s11 = int_to_ptr.vmem [resolvable:$true] %s72_s11 }
   0x5   :  { %34 = vmatmul.f32.vlgmr.msra.gmra.mxu0 %v15_v0  ;;  %54 = vmatmul.f32.vlgmr.msra.gmra.mxu1 %v16_v1 }
   0xa   :  { %v17_v4 = vld [vmem:[#allocation2] sm:$0xff] }
  0x82   :  { %v35_v3 = vpop.f32.mrf.mxu0  ;;  %v55_v5 = vpop.f32.mrf.mxu1 }
  0x83   :  { %v56_v6 = vadd.f32 %v55_v5, %v35_v3 }
  0x85   :  { %v58_v7 = vadd.f32 %v56_v6, %v17_v4 }
  0x87   :  { %60 = vst.msk [vmem:[#allocation2] sm:$0xff] %vm13_vm0, %v58_v7 }
  0x8e   :  { %v64_v8 = vld [vmem:[#allocation2] sm:$0xff] }
  0x8f   :  { %v65_v9 = vmul.f32 0.00048828125, %v64_v8 }
  0x91   :  { %66 = vst.msk [vmem:[#allocation2] sm:$0xff] %vm13_vm0, %v65_v9 }
  0x92   :  { %77 = dma.vmem_to_hbm [thread:$0]  %s73_s11, 128, %s75_s13, [#allocation3]  }
  0x93   :  { %109 = dma.done.wait [#allocation3], 128  }
  0x94   :  { %110 = vsyncadd [#allocation3], 4294967168 }
  0x95   :  { %82 = vsyncpa [#allocation3], 1 }

</bundles_post_ra>
